<compile_context>
chip_gen: v5e
topology: v5e:2x2
jax: 0.10.0
libtpu: 0.0.40
codegen_flags: <defaults>
</compile_context>

<pallas_src>
import functools

import numpy as np
import jax
import jax.numpy as jnp
from jax.experimental import pallas as pl
from jax.experimental.pallas import tpu as pltpu


def _round_up(n, m):
    return ((n + m - 1) // m) * m


def _detection_head_kernel(x_ref, w_ref, b_ref,
                           cls_ref, reg_ref, dir_ref,
                           *, oc_cls, oc_reg, oc_dir, off_reg, off_dir):
    # x tile:    (1, C, TILE_HW)          -> (C, TILE_HW) after [0]
    # w (fused): (oc_total_padded, C)     resident across the whole grid
    # b (fused): (oc_total_padded, 1)     broadcast along lanes
    x = x_ref[0]
    out = jnp.dot(w_ref[...], x, preferred_element_type=jnp.float32) + b_ref[...]
    # Split the fused result across the three heads. Slice starts (0, off_reg,
    # off_dir) are multiples of 8 (sublane-aligned) by construction.
    cls_ref[0] = out[0:oc_cls].astype(cls_ref.dtype)
    reg_ref[0] = out[off_reg:off_reg + oc_reg].astype(reg_ref.dtype)
    dir_ref[0] = out[off_dir:off_dir + oc_dir].astype(dir_ref.dtype)


def detection_head_forward(x_nchw, params, *, tile_hw=8192):
    """Forward pass of DetectionHead.

    x_nchw: (B, C, H, W), float32 (or bf16 if the producer already emits bf16).
    params: dict with PyTorch-layout weights:
        w_cls (A*K, C), b_cls (A*K, 1), w_reg (A*7, C), b_reg (A*7, 1),
        w_dir (A*2, C), b_dir (A*2, 1).
    Returns (cls_pred, reg_pred, dir_pred) in NCHW, float32.
    """
    assert tile_hw % 128 == 0, "tile_hw must be a multiple of 128 (lane width)"
    B, C, H, W = x_nchw.shape
    HW = H * W

    w_cls, b_cls = params["w_cls"], params["b_cls"]
    w_reg, b_reg = params["w_reg"], params["b_reg"]
    w_dir, b_dir = params["w_dir"], params["b_dir"]
    oc_cls, oc_reg, oc_dir = w_cls.shape[0], w_reg.shape[0], w_dir.shape[0]

    # Fuse the three heads into one weight / bias, zero-padding each head's
    # output-channel count to a multiple of 8 so the in-kernel split starts on
    # sublane boundaries. Padded rows are zero and never written back.
    oc_cls_p = _round_up(oc_cls, 8)
    oc_reg_p = _round_up(oc_reg, 8)
    oc_dir_p = _round_up(oc_dir, 8)
    off_reg = oc_cls_p
    off_dir = oc_cls_p + oc_reg_p
    oc_total_p = oc_cls_p + oc_reg_p + oc_dir_p

    def pad_rows(a, rows_p):
        return jnp.pad(a, ((0, rows_p - a.shape[0]), (0, 0)))

    w_all = jnp.concatenate([pad_rows(w_cls, oc_cls_p),
                             pad_rows(w_reg, oc_reg_p),
                             pad_rows(w_dir, oc_dir_p)], axis=0)   # (oc_total_p, C)
    b_all = jnp.concatenate([pad_rows(b_cls, oc_cls_p),
                             pad_rows(b_reg, oc_reg_p),
                             pad_rows(b_dir, oc_dir_p)], axis=0)   # (oc_total_p, 1)
    b_all = b_all.astype(jnp.float32)

    # Consume bf16 activations directly if the producer made them (no extra
    # cast of x here — a standalone cast would be its own HBM round trip).
    if x_nchw.dtype == jnp.bfloat16:
        w_all = w_all.astype(jnp.bfloat16)
    else:
        w_all = w_all.astype(x_nchw.dtype)

    # View as (B, C, H*W) — free reshape, no data movement. No padding of HW:
    # the grid handles the partial boundary tile.
    x_flat = x_nchw.reshape(B, C, HW)
    tile = min(tile_hw, _round_up(HW, 128))
    num_tiles = pl.cdiv(HW, tile)
    grid = (B, num_tiles)

    def x_map(b, t):
        return (b, 0, t)

    def whole(b, t):
        return (0, 0)

    out_shapes = (
        jax.ShapeDtypeStruct((B, oc_cls, HW), jnp.float32),
        jax.ShapeDtypeStruct((B, oc_reg, HW), jnp.float32),
        jax.ShapeDtypeStruct((B, oc_dir, HW), jnp.float32),
    )

    kernel = functools.partial(
        _detection_head_kernel,
        oc_cls=oc_cls, oc_reg=oc_reg, oc_dir=oc_dir,
        off_reg=off_reg, off_dir=off_dir)

    oc_total = oc_cls + oc_reg + oc_dir
    x_bytes = B * C * HW * x_nchw.dtype.itemsize
    out_bytes = B * oc_total * HW * 4
    w_bytes = oc_total_p * (C * w_all.dtype.itemsize + 4)
    cost = pl.CostEstimate(
        flops=2 * B * HW * C * oc_total,
        transcendentals=0,
        bytes_accessed=x_bytes + out_bytes + w_bytes,
    )

    cls_flat, reg_flat, dir_flat = pl.pallas_call(
        kernel,
        out_shape=out_shapes,
        grid_spec=pltpu.PrefetchScalarGridSpec(
            num_scalar_prefetch=0,
            grid=grid,
            in_specs=[
                pl.BlockSpec((1, C, tile), x_map),            # x pixel tile
                pl.BlockSpec((oc_total_p, C), whole),         # fused weight (resident)
                pl.BlockSpec((oc_total_p, 1), whole),         # fused bias (resident)
            ],
            out_specs=[
                pl.BlockSpec((1, oc_cls, tile), x_map),
                pl.BlockSpec((1, oc_reg, tile), x_map),
                pl.BlockSpec((1, oc_dir, tile), x_map),
            ],
        ),
        compiler_params=pltpu.CompilerParams(
            dimension_semantics=("parallel", "parallel"),
            # ~27 MiB peak for the real C=384 / tile=8192 case; 48 MiB stays
            # under v7x's 64 MiB physical VMEM and well under v5e/v6e's 128 MiB.
            vmem_limit_bytes=48 * 1024 * 1024,
        ),
        cost_estimate=cost,
    )(x_flat, w_all, b_all)

    def finish(flat):
        return flat.reshape(B, -1, H, W)

    return finish(cls_flat), finish(reg_flat), finish(dir_flat)


def init_detection_head_params(key, in_channel, n_anchors, n_classes):
    """Mirror PyTorch init: weight ~ N(0, 0.01); conv_cls bias = -log((1-p)/p), others 0.

    Weights are stored in PyTorch conv layout (out_channels, in_channels)."""
    k_cls, k_reg, k_dir = jax.random.split(key, 3)
    oc_cls = n_anchors * n_classes
    oc_reg = n_anchors * 7
    oc_dir = n_anchors * 2
    std = 0.01
    prior_prob = 0.01
    bias_init = float(-np.log((1.0 - prior_prob) / prior_prob))
    return {
        "w_cls": jax.random.normal(k_cls, (oc_cls, in_channel), jnp.float32) * std,
        "b_cls": jnp.full((oc_cls, 1), bias_init, jnp.float32),
        "w_reg": jax.random.normal(k_reg, (oc_reg, in_channel), jnp.float32) * std,
        "b_reg": jnp.zeros((oc_reg, 1), jnp.float32),
        "w_dir": jax.random.normal(k_dir, (oc_dir, in_channel), jnp.float32) * std,
        "b_dir": jnp.zeros((oc_dir, 1), jnp.float32),
    }


def _reference(x, params):
    """Plain-JAX reference: 1x1 conv == per-pixel channel matmul (NCHW)."""
    def head(w, b):
        return jnp.einsum('bchw,oc->bohw', x, w) + b.reshape(1, -1, 1, 1)
    return (head(params["w_cls"], params["b_cls"]),
            head(params["w_reg"], params["b_reg"]),
            head(params["w_dir"], params["b_dir"]))


if __name__ == "__main__":
    key = jax.random.PRNGKey(0)
    k_x, k_p, k_x2 = jax.random.split(key, 3)

    # Small shapes consistent with the module (real model: B, 384, 248, 216).
    B, C, H, W = 2, 32, 16, 16
    n_anchors, n_classes = 2, 3
    params = init_detection_head_params(k_p, C, n_anchors, n_classes)

    # Case 1: H*W lane-aligned (single full tile).
    x = jax.random.normal(k_x, (B, C, H, W), jnp.float32)
    cls_pred, reg_pred, dir_pred = detection_head_forward(x, params)
    jax.block_until_ready((cls_pred, reg_pred, dir_pred))

    ref_cls, ref_reg, ref_dir = _reference(x, params)
    assert cls_pred.shape == (B, n_anchors * n_classes, H, W)
    assert reg_pred.shape == (B, n_anchors * 7, H, W)
    assert dir_pred.shape == (B, n_anchors * 2, H, W)
    np.testing.assert_allclose(np.asarray(cls_pred), np.asarray(ref_cls), rtol=1e-5, atol=1e-5)
    np.testing.assert_allclose(np.asarray(reg_pred), np.asarray(ref_reg), rtol=1e-5, atol=1e-5)
    np.testing.assert_allclose(np.asarray(dir_pred), np.asarray(ref_dir), rtol=1e-5, atol=1e-5)

    # Case 2: H*W NOT a multiple of 128 — exercises the unpadded partial
    # boundary-block path (mirrors the real 248*216 = 53568 spatial size,
    # which is not a multiple of the tile).
    H2, W2 = 10, 13
    x2 = jax.random.normal(k_x2, (B, C, H2, W2), jnp.float32)
    cls2, reg2, dir2 = detection_head_forward(x2, params)
    jax.block_until_ready((cls2, reg2, dir2))
    r_cls2, r_reg2, r_dir2 = _reference(x2, params)
    np.testing.assert_allclose(np.asarray(cls2), np.asarray(r_cls2), rtol=1e-5, atol=1e-5)
    np.testing.assert_allclose(np.asarray(reg2), np.asarray(r_reg2), rtol=1e-5, atol=1e-5)
    np.testing.assert_allclose(np.asarray(dir2), np.asarray(r_dir2), rtol=1e-5, atol=1e-5)

    # Case 3: multiple pixel tiles (small tile_hw) + partial last tile.
    H3, W3 = 17, 23   # 391 pixels, tile 128 -> 4 tiles, last one partial
    x3 = jax.random.normal(k_x, (B, C, H3, W3), jnp.float32)
    cls3, reg3, dir3 = detection_head_forward(x3, params, tile_hw=128)
    jax.block_until_ready((cls3, reg3, dir3))
    r_cls3, r_reg3, r_dir3 = _reference(x3, params)
    np.testing.assert_allclose(np.asarray(cls3), np.asarray(r_cls3), rtol=1e-5, atol=1e-5)
    np.testing.assert_allclose(np.asarray(reg3), np.asarray(r_reg3), rtol=1e-5, atol=1e-5)
    np.testing.assert_allclose(np.asarray(dir3), np.asarray(r_dir3), rtol=1e-5, atol=1e-5)

    print("KERNEL_OK")
</pallas_src>

<mosaic_0001>
module attributes {stable_mosaic.version = 11 : i64} {
  func.func @_detection_head_kernel(%arg0: i32, %arg1: i32, %arg2: memref<1x32x256xf32, #tpu.memory_space<vmem>>, %arg3: memref<32x32xf32, #tpu.memory_space<vmem>>, %arg4: memref<32x1xf32, #tpu.memory_space<vmem>>, %arg5: memref<1x6x256xf32, #tpu.memory_space<vmem>>, %arg6: memref<1x14x256xf32, #tpu.memory_space<vmem>>, %arg7: memref<1x4x256xf32, #tpu.memory_space<vmem>>) attributes {dimension_semantics = [#tpu.dimension_semantics<parallel>, #tpu.dimension_semantics<parallel>], iteration_bounds = array<i64: 2, 1>, scalar_prefetch = 0 : i64, scratch_operands = 0 : i64, tpu.core_type = #tpu.core_type<tc>, window_params = [{transform_indices = @transform_0, window_bounds = array<i64: 1, 32, 256>}, {pipeline_mode = #tpu.pipeline_mode<synchronous>, transform_indices = @transform_1, window_bounds = array<i64: 32, 32>}, {pipeline_mode = #tpu.pipeline_mode<synchronous>, transform_indices = @transform_2, window_bounds = array<i64: 32, 1>}, {transform_indices = @transform_3, window_bounds = array<i64: 1, 6, 256>}, {transform_indices = @transform_4, window_bounds = array<i64: 1, 14, 256>}, {transform_indices = @transform_5, window_bounds = array<i64: 1, 4, 256>}]} {
    %c0 = arith.constant 0 : index
    %c0_0 = arith.constant 0 : index
    %c0_1 = arith.constant 0 : index
    %0 = vector.load %arg2[%c0, %c0_0, %c0_1] : memref<1x32x256xf32, #tpu.memory_space<vmem>>, vector<1x32x256xf32>
    %1 = vector.shape_cast %0 : vector<1x32x256xf32> to vector<32x256xf32>
    %c0_2 = arith.constant 0 : index
    %c0_3 = arith.constant 0 : index
    %2 = vector.load %arg3[%c0_2, %c0_3] : memref<32x32xf32, #tpu.memory_space<vmem>>, vector<32x32xf32>
    %cst = arith.constant dense<0.000000e+00> : vector<32x256xf32>
    %3 = tpu.matmul %2, %1, %cst {dimension_numbers = #tpu.dot_dimension_numbers<[1], [0], [0], [1], [0, 0, 1, 1], [], []>} : vector<32x32xf32>, vector<32x256xf32>, vector<32x256xf32> -> vector<32x256xf32>
    %c0_4 = arith.constant 0 : index
    %c0_5 = arith.constant 0 : index
    %4 = vector.load %arg4[%c0_4, %c0_5] : memref<32x1xf32, #tpu.memory_space<vmem>>, vector<32x1xf32>
    %5 = vector.broadcast %4 : vector<32x1xf32> to vector<32x256xf32>
    %6 = arith.addf %3, %5 : vector<32x256xf32>
    %7 = vector.extract_strided_slice %6 {offsets = [0, 0], sizes = [6, 256], strides = [1, 1]} : vector<32x256xf32> to vector<6x256xf32>
    %c0_6 = arith.constant 0 : index
    %c0_7 = arith.constant 0 : index
    %c0_8 = arith.constant 0 : index
    %8 = vector.load %arg5[%c0_6, %c0_7, %c0_8] : memref<1x6x256xf32, #tpu.memory_space<vmem>>, vector<1x6x256xf32>
    %9 = vector.shape_cast %8 : vector<1x6x256xf32> to vector<6x256xf32>
    %10 = vector.shape_cast %7 : vector<6x256xf32> to vector<1x6x256xf32>
    tpu.vector_store %arg5[%c0_6, %c0_7, %c0_8], %10 {strides = array<i32>} : memref<1x6x256xf32, #tpu.memory_space<vmem>>, vector<1x6x256xf32>,
    %11 = vector.extract_strided_slice %6 {offsets = [8, 0], sizes = [14, 256], strides = [1, 1]} : vector<32x256xf32> to vector<14x256xf32>
    %c0_9 = arith.constant 0 : index
    %c0_10 = arith.constant 0 : index
    %c0_11 = arith.constant 0 : index
    %12 = vector.load %arg6[%c0_9, %c0_10, %c0_11] : memref<1x14x256xf32, #tpu.memory_space<vmem>>, vector<1x14x256xf32>
    %13 = vector.shape_cast %12 : vector<1x14x256xf32> to vector<14x256xf32>
    %14 = vector.shape_cast %11 : vector<14x256xf32> to vector<1x14x256xf32>
    tpu.vector_store %arg6[%c0_9, %c0_10, %c0_11], %14 {strides = array<i32>} : memref<1x14x256xf32, #tpu.memory_space<vmem>>, vector<1x14x256xf32>,
    %15 = vector.extract_strided_slice %6 {offsets = [24, 0], sizes = [4, 256], strides = [1, 1]} : vector<32x256xf32> to vector<4x256xf32>
    %c0_12 = arith.constant 0 : index
    %c0_13 = arith.constant 0 : index
    %c0_14 = arith.constant 0 : index
    %16 = vector.load %arg7[%c0_12, %c0_13, %c0_14] : memref<1x4x256xf32, #tpu.memory_space<vmem>>, vector<1x4x256xf32>
    %17 = vector.shape_cast %16 : vector<1x4x256xf32> to vector<4x256xf32>
    %18 = vector.shape_cast %15 : vector<4x256xf32> to vector<1x4x256xf32>
    tpu.vector_store %arg7[%c0_12, %c0_13, %c0_14], %18 {strides = array<i32>} : memref<1x4x256xf32, #tpu.memory_space<vmem>>, vector<1x4x256xf32>,
    return
  }
  func.func @transform_0(%arg0: i32, %arg1: i32) -> (i32, i32, i32) {
    %c0_i32 = arith.constant 0 : i32
    %c0_i32_0 = arith.constant 0 : i32
    return %arg0, %c0_i32, %arg1 : i32, i32, i32
  }
  func.func @transform_1(%arg0: i32, %arg1: i32) -> (i32, i32) {
    %c0_i32 = arith.constant 0 : i32
    %c0_i32_0 = arith.constant 0 : i32
    %c0_i32_1 = arith.constant 0 : i32
    return %c0_i32, %c0_i32_0 : i32, i32
  }
  func.func @transform_2(%arg0: i32, %arg1: i32) -> (i32, i32) {
    %c0_i32 = arith.constant 0 : i32
    %c0_i32_0 = arith.constant 0 : i32
    %c0_i32_1 = arith.constant 0 : i32
    return %c0_i32, %c0_i32_0 : i32, i32
  }
  func.func @transform_3(%arg0: i32, %arg1: i32) -> (i32, i32, i32) {
    %c0_i32 = arith.constant 0 : i32
    %c0_i32_0 = arith.constant 0 : i32
    return %arg0, %c0_i32, %arg1 : i32, i32, i32
  }
  func.func @transform_4(%arg0: i32, %arg1: i32) -> (i32, i32, i32) {
    %c0_i32 = arith.constant 0 : i32
    %c0_i32_0 = arith.constant 0 : i32
    return %arg0, %c0_i32, %arg1 : i32, i32, i32
  }
  func.func @transform_5(%arg0: i32, %arg1: i32) -> (i32, i32, i32) {
    %c0_i32 = arith.constant 0 : i32
    %c0_i32_0 = arith.constant 0 : i32
    return %arg0, %c0_i32, %arg1 : i32, i32, i32
  }
}

</mosaic_0001>

<bundles_post_ra>
// kernel: tpu_custom_call.1
= control target key start
LH: loop header
LB: loop body
LE: loop exit
PB: predicated region body
PF: predicated region fallthrough
CT: control target
= control target key end

     0   :  { %11 = vsyncpa [#allocation3], 0  ;;  %s1049_s0 = inlined_call_operand.hbm [shape: f32[2,32,256], index: 0, kind: input, shape index: {}]   ;;  %s1050_s1 = inlined_call_operand.vmem [shape: f32[32,32], index: 1, kind: input, shape index: {}]   ;;  %s1051_s2 = inlined_call_operand.vmem [shape: f32[32,1], index: 2, kind: input, shape index: {}]   ;;  %s1052_s3 = inlined_call_operand.vmem [shape: f32[2,6,256], index: 3, kind: output, shape index: {0}]   ;;  %s1053_s4 = inlined_call_operand.vmem [shape: f32[2,14,256], index: 4, kind: output, shape index: {1}]   ;;  %s1054_s5 = inlined_call_operand.hbm [shape: f32[2,4,256], index: 5, kind: output, shape index: {2}]  }
   0x1   :  { %13 = vsyncpa [#allocation3 + $0x1], 0 }
   0x2   :  { %14 = vsyncpa [#allocation4], 0 }
   0x3   :  { %16 = vsyncpa [#allocation4 + $0x1], 0  ;;  %s888_s18 = smov 0   ;;  %s890_s19 = smov 0  }
   0x4   :  { %s892_s20 = smov 0   ;;  %s894_s21 = smov 0  }
   0x5   :  { %s896_s22 = smov 0   ;;  %s898_s23 = smov 0  }
   0x6 LB: > { %s635_s24 = sadd.s32 4294967295, %s853_s23   ;;  %s636_s25 = sadd.s32 4294967294, %s853_s23   ;;  %s853_s23 = sphi %s898_s23, %s22_s23   ;;  %s849_s22 = sphi %s896_s22, %s1063_s22   ;;  %s845_s21 = sphi %s894_s21, %s1062_s21   ;;  %s841_s20 = sphi %s892_s20, %s1061_s20   ;;  %s837_s19 = sphi %s890_s19, %s1060_s19   ;;  %s833_s18 = sphi %s888_s18, %s1059_s18  }
   0x7   : > { %s34_s26 = sadd.s32 1, %s849_s22  ;;  %s43_s27 = sadd.s32 1, %s841_s20 }
   0x8   : > { %p36_p0 = scmp.ge.s32.totalorder %s34_s26, 2  ;;  %p50_p1 = scmp.ne.s32.totalorder %s841_s20, %s837_s19 }
   0x9   : > { %p51_p2 = scmp.eq.s32.totalorder %s853_s23, 0  ;;  %p56_p3 = scmp.ne.s32.totalorder %s837_s19, %s833_s18 }
   0xa   : > { %s1065_s26 = smov (%p36_p0, %s34_s26), 0  ;;  %p57_p5 = scmp.eq.s32.totalorder %s635_s24, 0 }
   0xb   : > { %p929_p4 = por %p51_p2, %p50_p1  ;;  %s38_s29 = ssub.s32 %s849_s22, %s1065_s26 }
   0xc   : > { %p180_p6 = scmp.eq.s32.totalorder %s635_s24, 1  ;;  %p41_p7 = scmp.eq.s32.totalorder %s38_s29, 0 }
   0xd   : > { %p935_p8 = por %p57_p5, %p56_p3  ;;  %p186_p10 = scmp.eq.s32.totalorder %s636_s25, 1 }
   0xe   : > { %p939_p9 = por %p180_p6, %p50_p1  ;;  %p638_p12 = scmp.ge.s32.totalorder %s853_s23, 2 }
   0xf   : > { %s944_s7 = scalar_select %p41_p7, %s841_s20, %s43_s27  }
  0x10   : > { %p946_p11 = por %p186_p10, %p56_p3  ;;  %p686_p13 = scmp.lt.s32.totalorder %s853_s23, 2 }
  0x11   : > { %s212_s9 = sand.u32 1, %s841_s20   ;;  %s662_s11 = sshll.u32 %s849_s22, 6 }
  0x12   : > { %s639_s10 = sshll.u32 %s212_s9, 6  ;;  %s223_s14 = scalar_lea.hbm %s1049_s0, %s662_s11 }
  0x13   : > { %s216_s15 = scalar_lea.vmem [#allocation2], %s639_s10  ;;  %s224_s17 = sshll.u32 %s223_s14, 4  ;;  %s225_s17 = int_to_ptr.hbm [resolvable:$true] %s224_s17 }
  0x14   : > { %s226_s16 = sshll.u32 %s216_s15, 4  ;;  %p679_p0 = pnand %p686_p13, %p929_p4  ;;  %s227_s16 = int_to_ptr.vmem [resolvable:$true] %s226_s16 }
  0x15   : > { %p642_p1 = scmp.ge.s32.totalorder %s853_s23, 1  ;;  %s213_s24 = scalar_lea.sflag [#allocation3], %s212_s9 }
  0x16   : > { %s855_s25 = smov 256   ;;  %s856_s27 = smov 16  }
  0x17   : > { %681 = dma.hbm_to_vmem [thread:$0]  (!%p679_p0), %s225_s17, 1024, %s227_s16, %s213_s24, %s855_s25, %s855_s25, %s856_s27  }
  0x18   : > { %p234_p2 = scmp.lt.s32.totalorder %s853_s23, 3 }
  0x1a   : > { %p235_p3 = pnand %p642_p1, %p234_p2 }
  0x1b   : > { %s962_s29 = sand.u32 (!%p235_p3), 1, %s837_s19  }
  0x1c   : > { %238 = sbr.rel (%p235_p3) target bundleno = 191 (0xbf), region = 32  ;;  %s643_s10 = sshll.u32 (!%p235_p3), %s962_s29, 6 }
  0x1d   : > { %s241_s11 = scalar_lea.sflag (!%p235_p3), [#allocation3], %s962_s29  ;;  %s244_s12 = scalar_lea.vmem (!%p235_p3), [#allocation2], %s643_s10 }
  0x21   : > { %824 = dma.done.wait (%p935_p8), %s241_s11, 1024  }
  0x22   : > { %826 = vsyncadd (%p935_p8), %s241_s11, 4294966272  ;;  %v857_v0 = vmov 0   ;;  %v318_v1 = vld [vmem:[%s244_s12 + $0x30] sm:$0xff]  ;;  %v319_v2 = vld [vmem:[%s244_s12 + $0x38] sm:$0xff]  ;;  %vm348_vm0 = vcmask 261120   ;;  %p292_p4 = scmp.lt.s32.totalorder %s845_s21, 1 }
  0x23   : > { %740 = vset.pattern.permute.xlu1 %v857_v0  ;;  %739 = vset.pattern.permute.xlu0 %v857_v0  ;;  %v316_v3 = vld [vmem:[%s244_s12 + $0x20] sm:$0xff]  ;;  %v317_v4 = vld [vmem:[%s244_s12 + $0x28] sm:$0xff]  ;;  %v314_v5 = vld [vmem:[%s244_s12 + $0x10] sm:$0xff]  ;;  %s644_s10 = sshll.u32 %s962_s29, 3  ;;  %s665_s11 = sshll.u32 %s845_s21, 3  ;;  %vm428_vm1 = vcmask 1043456  }
  0x24   : > { %666 = vmatpush.msra.mxu2 %v318_v1  ;;  %670 = vmatpush.msra.mxu3 %v319_v2  ;;  %v315_v6 = vld [vmem:[%s244_s12 + $0x18] sm:$0xff]  ;;  %v312_v7 = vld [vmem:[%s244_s12] sm:$0xff]  ;;  %v313_v8 = vld [vmem:[%s244_s12 + $0x8] sm:$0xff]  ;;  %s293_s9 = scalar_select %p292_p4, %s845_s21, 1 }
  0x25   : > { %373 = vmatpush.msra.mxu0 %v318_v1  ;;  %402 = vmatpush.msra.mxu1 %v319_v2  ;;  %v322_v9 = vld [vmem:[%s1050_s1 + $0x10] sm:$0xff]  ;;  %v320_v10 = vld [vmem:[%s1050_s1] sm:$0xff]  ;;  %v325_v11 = vld [vmem:[%s1051_s2 + $0x8] sm:$0xff]  ;;  %s472_s30 = scalar_lea.hbm %s1054_s5, %s665_s11  ;;  %s451_s21 = scalar_lea.sflag [#allocation4], %s962_s29 }
  0x26   : > { %667 = vmatpush.msra.mxu2 %v316_v3  ;;  %671 = vmatpush.msra.mxu3 %v317_v4  ;;  %v327_v12 = vld [vmem:[%s1051_s2 + $0x18] sm:$0xff]  ;;  %v321_v14 = vld [vmem:[%s1050_s1 + $0x8] sm:$0xff]  ;;  %v326_v15 = vld [vmem:[%s1051_s2 + $0x10] sm:$0xff]  ;;  %s663_s13 = sshll.u32 %s293_s9, 4  ;;  %s664_s17 = sshll.u32 %s293_s9, 5 }
  0x27   : > { %374 = vmatpush.msra.mxu0 %v316_v3  ;;  %403 = vmatpush.msra.mxu1 %v317_v4  ;;  %v323_v13 = vld [vmem:[%s1050_s1 + $0x18] sm:$0xff]  ;;  %v324_v16 = vld [vmem:[%s1051_s2] sm:$0xff]  ;;  %s299_s16 = scalar_lea.vmem %s1052_s3, %s663_s13  ;;  %s309_s27 = scalar_lea.vmem %s1053_s4, %s664_s17 }
  0x28   : > { %668 = vmatpush.msra.mxu2 %v314_v5  ;;  %672 = vmatpush.msra.mxu3 %v315_v6  ;;  %s289_s9 = scalar_lea.vmem [#allocation5], %s644_s10  ;;  %s476_s14 = sshll.u32 %s472_s30, 4  ;;  %s477_s14 = int_to_ptr.hbm [resolvable:$true] %s476_s14 }
  0x29   : > { %375 = vmatpush.msra.mxu0 %v314_v5  ;;  %404 = vmatpush.msra.mxu1 %v315_v6  ;;  %s474_s13 = sshll.u32 %s289_s9, 4  ;;  %s785_s15 = sshra.s32 %s477_s14, 4  ;;  %s475_s13 = int_to_ptr.vmem [resolvable:$true] %s474_s13  ;;  %s786_s15 = int_to_ptr.hbm [resolvable:$true] %s785_s15 }
  0x2a   : > { %669 = vmatpush.msra.mxu2 %v312_v7  ;;  %673 = vmatpush.msra.mxu3 %v313_v8  ;;  %s791_s25 = scalar_lea.hbm %s1054_s5, 16  ;;  %p792_p8 = scmp.lt.s32.totalorder %s786_s15, %s1054_s5 }
  0x2b   : > { %651 = vmatmul.msk.f32.vlgmr.msra.gmra.mxu2 %vm348_vm0, %v322_v9  ;;  %655 = vmatmul.msk.f32.vlgmr.msra.gmra.mxu3 %vm348_vm0, %v322_v9 }
  0x2c   : > { %376 = vmatpush.msra.mxu0 %v312_v7  ;;  %405 = vmatpush.msra.mxu1 %v313_v8 }
  0x2d   : > { %649 = vmatmul.msk.f32.vlgmr.msra.gmra.mxu0 %vm348_vm0, %v320_v10  ;;  %653 = vmatmul.msk.f32.vlgmr.msra.gmra.mxu1 %vm348_vm0, %v320_v10 }
  0x2e   : > { %335 = vperm.xlu1 %740, %v325_v11   ;;  %345 = vperm.xlu0 %739, %v327_v12  }
  0x33   : > { %652 = vmatmul.msk.f32.gmra.mxu2 %vm348_vm0, %v323_v13  ;;  %656 = vmatmul.msk.f32.gmra.mxu3 %vm348_vm0, %v323_v13 }
  0x35   : > { %650 = vmatmul.msk.f32.gmra.mxu0 %vm348_vm0, %v321_v14  ;;  %654 = vmatmul.msk.f32.gmra.mxu1 %vm348_vm0, %v321_v14 }
  0x36   : > { %340 = vperm.xlu1 %740, %v326_v15   ;;  %330 = vperm.xlu0 %739, %v324_v16  }
  0xa0   : > { %v346_v17 = vpop.permute.xlu0 %345  ;;  %v336_v18 = vpop.permute.xlu1 %335 }
  0xa8   : > { %v331_v19 = vpop.permute.xlu0 %330  ;;  %v341_v24 = vpop.permute.xlu1 %340 }
  0xaa   : > { %v378_v20 = vpop.f32.mrf.mxu0  ;;  %v407_v21 = vpop.f32.mrf.mxu1 }
  0xab   : > { %v379_v22 = vadd.f32 %v378_v20, %v331_v19  ;;  %v408_v23 = vadd.f32 %v407_v21, %v331_v19 }
  0xad   : > { %419 = vst [vmem:[%s299_s16] sm:$0x3f] %v379_v22 }
  0xae   : > { %v384_v25 = vpop.f32.mrf.mxu2  ;;  %v413_v26 = vpop.f32.mrf.mxu3  ;;  %420 = vst [vmem:[%s299_s16 + $0x8] sm:$0x3f] %v408_v23  ;;  %s787_s16 = scalar_lea.hbm %s786_s15, 8 }
  0xaf   : > { %v385_v27 = vadd.f32 %v384_v25, %v341_v24  ;;  %v414_v28 = vadd.f32 %v413_v26, %v341_v24  ;;  %p788_p5 = scmp.ne.s32.totalorder %s786_s15, %s787_s16  ;;  %p793_p10 = scmp.lt.s32.totalorder %s791_s25, %s787_s16 }
  0xb1   : > { %423 = vst [vmem:[%s309_s27 + $0x10] sm:$0x3f] %v385_v27  ;;  %p789_p6 = pnand %p788_p5, %p939_p9  ;;  %p794_p13 = por %p793_p10, %p792_p8 }
  0xb2   : > { %424 = vst [vmem:[%s309_s27 + $0x18] sm:$0x3f] %v414_v28  ;;  %v381_v29 = vpop.f32.mrf.mxu0  ;;  %v410_v30 = vpop.f32.mrf.mxu1 }
  0xb3   : > { %v382_v31 = vadd.f32 %v381_v29, %v336_v18  ;;  %v411_v32 = vadd.f32 %v410_v30, %v336_v18  ;;  %p790_p7 = pneg %p789_p6 }
  0xb5   : > { %421 = vst [vmem:[%s309_s27] sm:$0xff] %v382_v31  ;;  %p795_p0 = pnand %p794_p13, %p790_p7 }
  0xb6   : > { %422 = vst [vmem:[%s309_s27 + $0x8] sm:$0xff] %v411_v32  ;;  %v387_v33 = vpop.f32.mrf.mxu2  ;;  %v416_v34 = vpop.f32.mrf.mxu3 }
  0xb7   : > { %v417_v35 = vadd.f32 %v416_v34, %v346_v17  ;;  %v388_v36 = vadd.f32 %v387_v33, %v346_v17 }
  0xb9   : > { %v427_v37 = vrot.slane %v417_v35, 4 }
  0xbb   : > { %v429_v38 = vsel %vm428_vm1, %v388_v36, %v427_v37 }
  0xbc   : > { %431 = vst [vmem:[%s289_s9] sm:$0xff] %v429_v38 }
  0xbd   : > { %798 = shalt.err (!%p795_p0)
}
  0xbe   : > { %676 = dma.vmem_to_hbm [thread:$0]  (%p939_p9), %s475_s13, 128, %s477_s14, %s451_s21  }
  0xbf PF: > { %s512_s29 = sand.u32 1, %s833_s18   ;;  %p683_p1 = pnand %p638_p12, %p946_p11 }
  0xc0   : > { %s513_s11 = scalar_lea.sflag [#allocation4], %s512_s29 }
  0xc1   : > { %p684_p2 = pneg %p683_p1 }
  0xc3   : > { %828 = dma.done.wait (%p684_p2), %s513_s11, 128  }
  0xc4   : > { %830 = vsyncadd (%p684_p2), %s513_s11, 4294967168  ;;  %s22_s23 = sadd.s32 1, %s853_s23   ;;  %s1059_s18 = smov %s837_s19 }
  0xc5   : > { %p19_p3 = scmp.ge.s32.totalorder %s22_s23, 4   ;;  %s1060_s19 = smov %s841_s20 }
  0xc6   : > { %s1061_s20 = smov %s944_s7  ;;  %s1062_s21 = smov %s849_s22 }
  0xc7   : > { %s1063_s22 = smov %s1065_s26  ;;  %21 = sbr.rel (!%p19_p3) target bundleno = 6 (0x6), region = 101 }
  0xcc   :  { %519 = vsyncpa [#allocation3], 1 }
  0xcd   :  { %521 = vsyncpa [#allocation3 + $0x1], 1 }
  0xce   :  { %522 = vsyncpa [#allocation4], 1 }
  0xcf   :  { %524 = vsyncpa [#allocation4 + $0x1], 1 }

</bundles_post_ra>
